<compile_context>
chip_gen: v7x
topology: tpu7x:2x2x1
jax: 0.10.0
libtpu: 0.0.40
codegen_flags: <defaults>
</compile_context>

<pallas_src>
import functools

import jax
import jax.numpy as jnp
from jax import lax
from jax.experimental import pallas as pl
from jax.experimental.pallas import tpu as pltpu

_VMEM_BUDGET = 32 * 1024 * 1024   # working-set target used for tile picking
_VMEM_LIMIT = 48 * 1024 * 1024    # scoped VMEM cap (safe on v5e/v6e/v7x)


def _round_up(x: int, m: int) -> int:
    return (x + m - 1) // m * m


def _sublane(itemsize: int) -> int:
    # f32 -> 8, bf16 -> 16, int8/fp8 -> 32 (packed sublane rows)
    return max(8, 32 // itemsize)


def _pick_tk(mp: int, k: int, itemsize: int, fixed_bytes: int):
    """Largest 128-multiple K tile that fits the VMEM budget and divides padded K."""
    kp128 = _round_up(k, 128)
    avail = max(_VMEM_BUDGET - fixed_bytes, 2 * mp * itemsize * 128)
    max_tk = avail // (2 * mp * itemsize)          # double-buffered (Mp, tk) tile
    desired = min(2048, (max_tk // 128) * 128, kp128)
    desired = max(desired, 128)
    for tk in range(desired, 127, -128):
        if kp128 % tk == 0:
            return tk, kp128
    return 128, kp128                               # kp128 % 128 == 0 always


# ---------------------------------------------------------------------------
# Kernels
# ---------------------------------------------------------------------------
def _gram_kernel(f_ref, g_ref, *, inv_norm):
    """Grid (Kp//tk,): accumulate F @ F.T directly into the resident G output."""
    k = pl.program_id(0)

    @pl.when(k == 0)
    def _():
        g_ref[...] = jnp.zeros_like(g_ref)

    f = f_ref[...]
    # Contract dim 1 of both operands: transpose folded into the MXU feed.
    g_ref[...] += lax.dot_general(
        f, f, dimension_numbers=(((1,), (1,)), ((), ())),
        preferred_element_type=jnp.float32)

    @pl.when(k == pl.num_programs(0) - 1)
    def _():
        g_ref[...] = g_ref[...] * inv_norm          # G.div(a*b*c*d)


def _gram_loss_kernel(f_ref, tgt_ref, loss_ref, acc_ref, *, inv_norm, inv_mse):
    """Loss-only variant: no G writeback; scalar MSE loss written to SMEM."""
    k = pl.program_id(0)

    @pl.when(k == 0)
    def _():
        acc_ref[...] = jnp.zeros_like(acc_ref)

    f = f_ref[...]
    acc_ref[...] += lax.dot_general(
        f, f, dimension_numbers=(((1,), (1,)), ((), ())),
        preferred_element_type=jnp.float32)

    @pl.when(k == pl.num_programs(0) - 1)
    def _():
        diff = acc_ref[...] * inv_norm - tgt_ref[...]
        loss_ref[0, 0] = jnp.sum(diff * diff) * inv_mse   # F.mse_loss 'mean'


# ---------------------------------------------------------------------------
# Wrappers
# ---------------------------------------------------------------------------
def _flatten_pad(x_nchw, mp: int, kp: int):
    a, b, c, d = x_nchw.shape
    m, k = a * b, c * d
    f = x_nchw.reshape(m, k)                         # keep input dtype (bf16 ok)
    return jnp.pad(f, ((0, mp - m), (0, kp - k)))    # zeros don't change F @ F.T


def gram_matrix_pallas(x_nchw: jax.Array) -> jax.Array:
    """Pallas equivalent of the PyTorch gram_matrix() helper (exact (M, M))."""
    a, b, c, d = x_nchw.shape
    m, k = a * b, c * d
    itemsize = x_nchw.dtype.itemsize
    mp = _round_up(m, _sublane(itemsize))
    fixed = mp * mp * 4                              # resident f32 G output
    tk, kp = _pick_tk(mp, k, itemsize, fixed)
    fp = _flatten_pad(x_nchw, mp, kp)
    n_k = kp // tk

    kernel = functools.partial(_gram_kernel, inv_norm=1.0 / float(m * k))
    # TODO(synk): for very large M on v7x, tile G into (tm, Mp) row blocks and
    # add a "parallel" grid axis so both TensorCores are used.
    g = pl.pallas_call(
        kernel,
        grid=(n_k,),
        in_specs=[pl.BlockSpec((mp, tk), lambda i: (0, i))],
        out_specs=pl.BlockSpec((mp, mp), lambda i: (0, 0)),
        out_shape=jax.ShapeDtypeStruct((mp, mp), jnp.float32),
        compiler_params=pltpu.CompilerParams(
            dimension_semantics=("arbitrary",),
            vmem_limit_bytes=_VMEM_LIMIT,
        ),
    )(fp)
    return g[:m, :m]


def style_layer_loss_pallas(x_nchw: jax.Array, target_g: jax.Array) -> jax.Array:
    """mean((gram(x) - target_g)**2) without writing gram(x) to HBM."""
    a, b, c, d = x_nchw.shape
    m, k = a * b, c * d
    itemsize = x_nchw.dtype.itemsize
    mp = _round_up(m, _sublane(itemsize))
    fixed = 3 * mp * mp * 4                          # f32 acc scratch + 2x target buf
    tk, kp = _pick_tk(mp, k, itemsize, fixed)
    fp = _flatten_pad(x_nchw, mp, kp)
    tp = jnp.pad(target_g.astype(jnp.float32), ((0, mp - m), (0, mp - m)))
    n_k = kp // tk

    kernel = functools.partial(
        _gram_loss_kernel,
        inv_norm=1.0 / float(m * k),
        inv_mse=1.0 / float(m * m),
    )
    loss = pl.pallas_call(
        kernel,
        grid=(n_k,),
        in_specs=[
            pl.BlockSpec((mp, tk), lambda i: (0, i)),
            pl.BlockSpec((mp, mp), lambda i: (0, 0)),   # constant index: DMA'd once
        ],
        out_specs=pl.BlockSpec(memory_space=pltpu.MemorySpace.SMEM),
        out_shape=jax.ShapeDtypeStruct((1, 1), jnp.float32),
        scratch_shapes=[pltpu.VMEM((mp, mp), jnp.float32)],
        compiler_params=pltpu.CompilerParams(
            dimension_semantics=("arbitrary",),
            vmem_limit_bytes=_VMEM_LIMIT,
        ),
    )(fp, tp)
    return loss[0, 0]


class StyleLossPallas:
    """Mirror of the PyTorch StyleLoss module.

    __init__ precomputes target gram matrices (detached constants);
    forward sums MSE(gram(input_i), target_i) over layers.
    """

    def __init__(self, targets_feature):
        self.target = [gram_matrix_pallas(t) for t in targets_feature]

    def forward(self, inputs):
        loss = jnp.float32(0.0)
        for x, tgt in zip(inputs, self.target):
            loss = loss + style_layer_loss_pallas(x, tgt)   # scalar glue in JAX
        return loss

    __call__ = forward


# ---------------------------------------------------------------------------
# Reference (plain JAX) for a correctness check.
# ---------------------------------------------------------------------------
def _gram_ref(x):
    a, b, c, d = x.shape
    f = x.reshape(a * b, c * d).astype(jnp.float32)
    return (f @ f.T) / float(a * b * c * d)


def _style_loss_ref(inputs, targets):
    loss = jnp.float32(0.0)
    for x, t in zip(inputs, targets):
        g = _gram_ref(x)
        tg = _gram_ref(t)
        loss = loss + jnp.mean((g - tg) ** 2)
    return loss


if __name__ == "__main__":
    key = jax.random.PRNGKey(0)
    k1, k2, k3, k4 = jax.random.split(key, 4)

    # Two "style layers": NCHW feature maps (matching PyTorch conv layout).
    target_feats = [
        jax.random.normal(k1, (2, 4, 16, 16), dtype=jnp.float32),
        jax.random.normal(k2, (2, 8, 8, 8), dtype=jnp.float32),
    ]
    input_feats = [
        jax.random.normal(k3, (2, 4, 16, 16), dtype=jnp.float32),
        jax.random.normal(k4, (2, 8, 8, 8), dtype=jnp.float32),
    ]

    style_loss = StyleLossPallas(target_feats)
    loss = style_loss(input_feats)
    loss = jax.block_until_ready(loss)

    ref = jax.block_until_ready(_style_loss_ref(input_feats, target_feats))
    assert jnp.allclose(loss, ref, rtol=1e-5, atol=1e-6), (loss, ref)

    print("KERNEL_OK")
</pallas_src>

<mosaic_0001>
module attributes {stable_mosaic.version = 11 : i64} {
  func.func @_gram_kernel(%arg0: i32, %arg1: memref<8x256xf32, #tpu.memory_space<vmem>>, %arg2: memref<8x8xf32, #tpu.memory_space<vmem>>) attributes {dimension_semantics = [#tpu.dimension_semantics<arbitrary>], iteration_bounds = array<i64: 1>, scalar_prefetch = 0 : i64, scratch_operands = 0 : i64, tpu.core_type = #tpu.core_type<tc>, window_params = [{transform_indices = @transform_0, window_bounds = array<i64: 8, 256>}, {pipeline_mode = #tpu.pipeline_mode<synchronous>, transform_indices = @transform_1, window_bounds = array<i64: 8, 8>}]} {
    %c0_i32 = arith.constant 0 : i32
    %0 = arith.cmpi eq, %arg0, %c0_i32 : i32
    %1 = arith.extui %0 : i1 to i32
    %c0_i32_0 = arith.constant 0 : i32
    %2 = arith.cmpi ne, %1, %c0_i32_0 : i32
    scf.if %2 {
      %cst_8 = arith.constant 0.000000e+00 : f32
      %11 = vector.broadcast %cst_8 : f32 to vector<8x8xf32>
      %c0_9 = arith.constant 0 : index
      %c0_10 = arith.constant 0 : index
      %12 = vector.load %arg2[%c0_9, %c0_10] : memref<8x8xf32, #tpu.memory_space<vmem>>, vector<8x8xf32>
      tpu.vector_store %arg2[%c0_9, %c0_10], %11 {strides = array<i32>} : memref<8x8xf32, #tpu.memory_space<vmem>>, vector<8x8xf32>,
    } else {
    }
    %c0 = arith.constant 0 : index
    %c0_1 = arith.constant 0 : index
    %3 = vector.load %arg1[%c0, %c0_1] : memref<8x256xf32, #tpu.memory_space<vmem>>, vector<8x256xf32>
    %c0_2 = arith.constant 0 : index
    %c0_3 = arith.constant 0 : index
    %4 = vector.load %arg2[%c0_2, %c0_3] : memref<8x8xf32, #tpu.memory_space<vmem>>, vector<8x8xf32>
    %cst = arith.constant dense<0.000000e+00> : vector<8x8xf32>
    %5 = tpu.matmul %3, %3, %cst {dimension_numbers = #tpu.dot_dimension_numbers<[1], [1], [0], [0], [0, 0, 1, 0], [], []>} : vector<8x256xf32>, vector<8x256xf32>, vector<8x8xf32> -> vector<8x8xf32>
    %6 = arith.addf %4, %5 : vector<8x8xf32>
    %c0_4 = arith.constant 0 : index
    %c0_5 = arith.constant 0 : index
    %7 = vector.load %arg2[%c0_4, %c0_5] : memref<8x8xf32, #tpu.memory_space<vmem>>, vector<8x8xf32>
    tpu.vector_store %arg2[%c0_4, %c0_5], %6 {strides = array<i32>} : memref<8x8xf32, #tpu.memory_space<vmem>>, vector<8x8xf32>,
    %c0_i32_6 = arith.constant 0 : i32
    %8 = arith.cmpi eq, %arg0, %c0_i32_6 : i32
    %9 = arith.extui %8 : i1 to i32
    %c0_i32_7 = arith.constant 0 : i32
    %10 = arith.cmpi ne, %9, %c0_i32_7 : i32
    scf.if %10 {
      %c0_8 = arith.constant 0 : index
      %c0_9 = arith.constant 0 : index
      %11 = vector.load %arg2[%c0_8, %c0_9] : memref<8x8xf32, #tpu.memory_space<vmem>>, vector<8x8xf32>
      %cst_10 = arith.constant 4.8828125E-4 : f32
      %12 = vector.broadcast %cst_10 : f32 to vector<8x8xf32>
      %13 = arith.mulf %11, %12 : vector<8x8xf32>
      %c0_11 = arith.constant 0 : index
      %c0_12 = arith.constant 0 : index
      %14 = vector.load %arg2[%c0_11, %c0_12] : memref<8x8xf32, #tpu.memory_space<vmem>>, vector<8x8xf32>
      tpu.vector_store %arg2[%c0_11, %c0_12], %13 {strides = array<i32>} : memref<8x8xf32, #tpu.memory_space<vmem>>, vector<8x8xf32>,
    } else {
    }
    return
  }
  func.func @transform_0(%arg0: i32) -> (i32, i32) {
    %c0_i32 = arith.constant 0 : i32
    %c0_i32_0 = arith.constant 0 : i32
    return %c0_i32, %arg0 : i32, i32
  }
  func.func @transform_1(%arg0: i32) -> (i32, i32) {
    %c0_i32 = arith.constant 0 : i32
    %c0_i32_0 = arith.constant 0 : i32
    %c0_i32_1 = arith.constant 0 : i32
    return %c0_i32, %c0_i32_0 : i32, i32
  }
}

</mosaic_0001>

<bundles_post_ra>
// kernel: tpu_custom_call.1
= control target key start
LH: loop header
LB: loop body
LE: loop exit
PB: predicated region body
PF: predicated region fallthrough
CT: control target
= control target key end

     0   :  { %6 = vsyncpa [#allocation3], 0  ;;  %s215_s0 = inlined_call_operand.hbm [shape: f32[8,256], index: 0, kind: input, shape index: {}]   ;;  %s216_s1 = inlined_call_operand.hbm [shape: f32[8,8], index: 1, kind: output, shape index: {}]  }
   0x1   :  { %7 = vsyncpa [#allocation4], 0  ;;  %s175_s6 = smov [#allocation2]   ;;  %s127_s10 = scalar_lea.hbm %s215_s0, 256 }
   0x2   :  { %s14_s7 = sshll.u32 %s175_s6, 4  ;;  %p128_p0 = scmp.ne.s32.totalorder %s215_s0, %s127_s10  ;;  %s15_s7 = int_to_ptr.vmem [resolvable:$true] %s14_s7 }
   0x3   :  { %p131_p1 = scmp.lt.u32.totalorder %s127_s10, %s215_s0 }
   0x5   :  { %p133_p2 = pnand %p131_p1, %p128_p0 }
   0x7   :  { %136 = shalt.err (!%p133_p2)
}
   0x8   :  { %s137_s15 = scalar_lea.vmem %s15_s7, 256  ;;  %p142_p4 = scmp.lt.s32.totalorder %s15_s7, %s15_s7 }
   0x9   :  { %p138_p3 = scmp.ne.s32.totalorder %s15_s7, %s137_s15  ;;  %p143_p5 = scmp.lt.s32.totalorder %s137_s15, %s137_s15 }
   0xb   :  { %p144_p6 = por %p143_p5, %p142_p4 }
   0xd   :  { %p145_p7 = pnand %p144_p6, %p138_p3 }
   0xf   :  { %148 = shalt.err (!%p145_p7)
}
  0x10   :  { %17 = dma.hbm_to_vmem [thread:$0]  %s215_s0, 256, %s15_s7, [#allocation3]  }
  0x11   :  { %171 = dma.done.wait [#allocation3], 256  }
  0x12   :  { %172 = vsyncadd [#allocation3], 4294967040  ;;  %vm25_vm0 = vcmask 64512   ;;  %v176_v0 = vmov 0.0   ;;  %v28_v1 = vld [vmem:[#allocation2 + $0x8] sm:$0xff]  ;;  %v27_v2 = vld [vmem:[#allocation2] sm:$0xff] }
  0x13   :  { %26 = vst.msk [vmem:[#allocation5] sm:$0xff] %vm25_vm0, %v176_v0  ;;  %30 = vmatprep.subr.mxu0 %v28_v1  ;;  %94 = vmatprep.mubr.f32.mxu0 %v28_v1  ;;  %s177_s18 = smov [#allocation5]  }
  0x14   :  { %31 = vmatpush1.xpose.msra.mxu0 %v27_v2  ;;  %s115_s0 = sshll.u32 %s177_s18, 4  ;;  %s116_s0 = int_to_ptr.vmem [resolvable:$true] %s115_s0 }
  0x15   :  { %s149_s19 = scalar_lea.vmem %s116_s0, 128  ;;  %p154_p9 = scmp.lt.s32.totalorder %s116_s0, %s116_s0 }
  0x16   :  { %p150_p8 = scmp.ne.s32.totalorder %s116_s0, %s149_s19  ;;  %p155_p10 = scmp.lt.s32.totalorder %s149_s19, %s149_s19 }
  0x17   :  { %95 = vmatmul.mubr.f32.vlgmr.msra.gmra.mrb[0].mxu0 %v27_v2 }
  0x18   :  { %p156_p11 = por %p155_p10, %p154_p9 }
  0x1a   :  { %v29_v3 = vld [vmem:[#allocation5] sm:$0xff]  ;;  %p157_p12 = pnand %p156_p11, %p150_p8 }
  0xea   :  { %v96_v4 = vpop.f32.mrb[0].mxu0 }
  0xeb   :  { %v100_v5 = vadd.f32 %v96_v4, %v29_v3  ;;  %v98_v6 = vpop.f32.mrb[1].mxu0 }
  0xed   :  { %102 = vst.msk [vmem:[#allocation5] sm:$0xff] %vm25_vm0, %v100_v5 }
  0xf4   :  { %v106_v7 = vld [vmem:[#allocation5] sm:$0xff] }
  0xf5   :  { %v107_v8 = vmul.f32 0.00048828125, %v106_v7 }
  0xf7   :  { %108 = vst.msk [vmem:[#allocation5] sm:$0xff] %vm25_vm0, %v107_v8 }
  0xf8   :  { %160 = shalt.err (!%p157_p12)
}
  0xf9   :  { %s161_s22 = scalar_lea.hbm %s216_s1, 128 }
  0xfa   :  { %p162_p13 = scmp.ne.s32.totalorder %s216_s1, %s161_s22  ;;  %p165_p0 = scmp.lt.u32.totalorder %s161_s22, %s216_s1 }
  0xfc   :  { %p167_p1 = pnand %p165_p0, %p162_p13 }
  0xfe   :  { %170 = shalt.err (!%p167_p1)
}
  0xff   :  { %118 = dma.vmem_to_hbm [thread:$0]  %s116_s0, 128, %s216_s1, [#allocation4]  }
 0x100   :  { %173 = dma.done.wait [#allocation4], 128  }
 0x101   :  { %174 = vsyncadd [#allocation4], 4294967168 }
 0x102   :  { %122 = vsyncpa [#allocation3], 1 }
 0x103   :  { %123 = vsyncpa [#allocation4], 1 }

</bundles_post_ra>
